<compile_context>
chip_gen: v5e
topology: v5e:2x2
jax: 0.10.0
libtpu: 0.0.40
codegen_flags: <defaults>
</compile_context>

<pallas_src>
import jax
import jax.numpy as jnp
from jax import lax
from jax.experimental import pallas as pl
from jax.experimental.pallas import tpu as pltpu

LANES = 128
SUBLANES = 8
TARGET_BLOCK_BYTES = 4 * 1024 * 1024   # ~4 MiB of DMA per input per buffer


def _detect_num_tensorcores():
    """How many TensorCores a 'parallel' leading grid axis can usefully span."""
    # Prefer the Pallas hardware query if it exposes a core count.
    try:
        info = pltpu.get_tpu_info()
        for attr in ("num_cores", "core_count", "num_tensorcores",
                     "tensorcore_count", "cores_per_chip"):
            v = getattr(info, attr, None)
            if isinstance(v, int) and v >= 1:
                return max(1, min(int(v), 2))
    except Exception:
        pass
    # Fall back to the chip-generation string.
    try:
        kind = (jax.devices()[0].device_kind or "").lower()
    except Exception:
        return 1
    if "lite" in kind or "v5e" in kind or "v6e" in kind or "v6" in kind:
        return 1                      # single TensorCore: v5e / v6e
    if "v7" in kind or "7x" in kind or "v5p" in kind or "v4" in kind:
        return 2                      # 2 TC per chip (v7x) / megacore (v4, v5p)
    if "v5" in kind:                  # non-lite v5 == v5p
        return 2
    return 1                          # unknown -> safe, always-correct default


def _pick_row_tile(rows, max_itemsize):
    """Rows per block so that one input block is ~TARGET_BLOCK_BYTES."""
    target_rows = TARGET_BLOCK_BYTES // (LANES * max_itemsize)
    target_rows = max(SUBLANES, (target_rows // SUBLANES) * SUBLANES)
    return min(rows, target_rows)     # rows is always a multiple of 8


def _make_input_spec(row_tile, index_map, buffer_count):
    if buffer_count and buffer_count != 2:
        try:
            return pl.BlockSpec((row_tile, LANES), index_map,
                                pipeline_mode=pl.Buffered(buffer_count))
        except TypeError:
            pass                      # older API: fall back to default buffering
    return pl.BlockSpec((row_tile, LANES), index_map)


def _make_dice_sums_kernel(row_tile, steps_per_core, total_blocks,
                           tail_valid_rows, num_cores):
    """kernel(o_ref, t_ref, acc_ref): per-core partial sums.

    acc_ref block: (1, 3, 8, LANES) f32, resident across the inner grid axis:
      acc[0,0] += fold8(sigmoid(o) * t)
      acc[0,1] += fold8(sigmoid(o))
      acc[0,2] += fold8(t)
    """
    full_blocks = total_blocks - (1 if tail_valid_rows else 0)
    has_extra = num_cores * steps_per_core > total_blocks   # clamped duplicates

    def fold8(x):
        # (row_tile, LANES) -> (8, LANES): layout-preserving reshape + pure
        # VPU adds (no cross-lane XLU work in the hot loop).
        return jnp.sum(x.reshape(row_tile // SUBLANES, SUBLANES, LANES), axis=0)

    def kernel(o_ref, t_ref, acc_ref):
        c = pl.program_id(0)
        i = pl.program_id(1)
        g = c * steps_per_core + i                 # global block index

        @pl.when(i == 0)
        def _():
            acc_ref[...] = jnp.zeros_like(acc_ref)

        def accumulate(row_mask):
            o = o_ref[...].astype(jnp.float32)
            t = t_ref[...].astype(jnp.float32)
            s = jax.nn.sigmoid(o)
            if row_mask is not None:
                # Select (not multiply): NaN/Inf garbage read past the real
                # extent of a ragged block cannot leak into the sums.
                s = jnp.where(row_mask, s, 0.0)
                t = jnp.where(row_mask, t, 0.0)
            acc_ref[0, 0] += fold8(s * t)
            acc_ref[0, 1] += fold8(s)
            acc_ref[0, 2] += fold8(t)

        if tail_valid_rows == 0 and not has_extra:
            # Every block is full and owned by exactly one core: the hot loop
            # is completely mask/branch free.
            accumulate(None)
        else:
            @pl.when(g < full_blocks)
            def _():                                # full blocks: no mask
                accumulate(None)

            if tail_valid_rows:
                @pl.when(g == total_blocks - 1)
                def _():                            # single ragged last block
                    ridx = lax.broadcasted_iota(jnp.int32, (row_tile, 1), 0)
                    accumulate(ridx < tail_valid_rows)
            # g >= total_blocks: clamped duplicate block -> skip entirely.

    return kernel


def _partial_sums_pallas(o2d, t2d, rows, row_tile, num_cores, buffer_count):
    """Returns (3,) f32: [sum(sigmoid(o)*t), sum(sigmoid(o)), sum(t)]."""
    total_blocks = pl.cdiv(rows, row_tile)
    num_cores = max(1, min(num_cores, total_blocks))
    steps_per_core = pl.cdiv(total_blocks, num_cores)
    tail_valid_rows = rows - (total_blocks - 1) * row_tile
    if tail_valid_rows == row_tile:
        tail_valid_rows = 0                        # last block is full

    def in_map(c, i):
        g = c * steps_per_core + i
        # Clamp so an overshooting core re-reads the last valid block; the
        # kernel skips accumulation for those duplicate blocks (g >= total).
        return (jnp.minimum(g, total_blocks - 1), 0)

    kernel = _make_dice_sums_kernel(row_tile, steps_per_core, total_blocks,
                                    tail_valid_rows, num_cores)

    block_bytes = row_tile * LANES * (o2d.dtype.itemsize + t2d.dtype.itemsize)
    vmem_limit = min(max(buffer_count * int(block_bytes) + (16 << 20),
                         32 << 20), 60 << 20)

    partials = pl.pallas_call(
        kernel,
        out_shape=jax.ShapeDtypeStruct(
            (num_cores, 3, SUBLANES, LANES), jnp.float32
        ),
        grid=(num_cores, steps_per_core),
        in_specs=[
            _make_input_spec(row_tile, in_map, buffer_count),
            _make_input_spec(row_tile, in_map, buffer_count),
        ],
        out_specs=pl.BlockSpec(
            (1, 3, SUBLANES, LANES), lambda c, i: (c, 0, 0, 0)
        ),
        compiler_params=pltpu.CompilerParams(
            dimension_semantics=("parallel", "arbitrary"),
            vmem_limit_bytes=vmem_limit,
        ),
    )(o2d, t2d)

    # Single cross-lane/sublane reduce, amortized over the whole tensor.
    return jnp.sum(partials, axis=(0, 2, 3))


def dice_loss(output, target):
    """Pallas-backed DiceLoss.forward(output, target)."""
    assert output.shape == target.shape, (output.shape, target.shape)

    o_flat = output.reshape(-1)   # native dtype; cast happens inside the kernel
    t_flat = target.reshape(-1)
    n = o_flat.shape[0]

    block_elems = SUBLANES * LANES                 # 1024
    n_main = (n // block_elems) * block_elems      # block-aligned prefix
    rows = n_main // LANES                         # multiple of 8

    sums = jnp.zeros((3,), jnp.float32)

    if rows > 0:
        o2d = o_flat[:n_main].reshape(rows, LANES)  # identity when n is aligned
        t2d = t_flat[:n_main].reshape(rows, LANES)
        max_item = max(o2d.dtype.itemsize, t2d.dtype.itemsize)
        row_tile = _pick_row_tile(rows, max_item)   # ~4 MiB per input per buffer
        num_cores = _detect_num_tensorcores()       # 2 on v7x/v5p/v4, else 1
        buffer_count = 3 if num_cores >= 2 else 2   # triple-buffer only on v7x-class
        sums = sums + _partial_sums_pallas(
            o2d, t2d, rows, row_tile, num_cores, buffer_count)

    if n_main < n:
        # Tiny (<1024 element) tail handled in plain JAX (no pad, no sentinel).
        o_tail = o_flat[n_main:].astype(jnp.float32)
        t_tail = t_flat[n_main:].astype(jnp.float32)
        s_tail = jax.nn.sigmoid(o_tail)
        sums = sums + jnp.stack(
            [jnp.sum(s_tail * t_tail), jnp.sum(s_tail), jnp.sum(t_tail)]
        )

    smooth = 1.0
    intersection = sums[0]
    union = sums[1] + sums[2]
    dice = (2.0 * intersection + smooth) / (union + smooth)
    return 1.0 - dice


def dice_loss_ref(output, target):
    """Pure-JAX reference matching the PyTorch module."""
    s = jax.nn.sigmoid(output.astype(jnp.float32))
    t = target.astype(jnp.float32)
    intersection = jnp.sum(s * t)
    union = jnp.sum(s) + jnp.sum(t)
    smooth = 1.0
    dice = (2.0 * intersection + smooth) / (union + smooth)
    return 1.0 - dice


if __name__ == "__main__":
    key = jax.random.PRNGKey(0)
    k1, k2 = jax.random.split(key)
    # NCHW, small shapes consistent with a segmentation logit / mask pair.
    output = jax.random.normal(k1, (2, 4, 16, 16), dtype=jnp.float32)
    target = (jax.random.uniform(k2, (2, 4, 16, 16)) > 0.5).astype(jnp.float32)

    loss = jax.block_until_ready(dice_loss(output, target))
    ref = jax.block_until_ready(dice_loss_ref(output, target))

    assert jnp.allclose(loss, ref, atol=1e-5, rtol=1e-5), (loss, ref)
    print("KERNEL_OK")
</pallas_src>

<mosaic_0001>
module attributes {stable_mosaic.version = 11 : i64} {
  func.func @kernel(%arg0: i32, %arg1: i32, %arg2: memref<16x128xf32, #tpu.memory_space<vmem>>, %arg3: memref<16x128xf32, #tpu.memory_space<vmem>>, %arg4: memref<1x3x8x128xf32, #tpu.memory_space<vmem>>) attributes {dimension_semantics = [#tpu.dimension_semantics<parallel>, #tpu.dimension_semantics<arbitrary>], iteration_bounds = array<i64: 1, 1>, scalar_prefetch = 0 : i64, scratch_operands = 0 : i64, tpu.core_type = #tpu.core_type<tc>, window_params = [{transform_indices = @transform_0, window_bounds = array<i64: 16, 128>}, {transform_indices = @transform_1, window_bounds = array<i64: 16, 128>}, {transform_indices = @transform_2, window_bounds = array<i64: 1, 3, 8, 128>}]} {
    %c0_i32 = arith.constant 0 : i32
    %0 = arith.cmpi eq, %arg1, %c0_i32 : i32
    %1 = arith.extui %0 : i1 to i32
    %c0_i32_0 = arith.constant 0 : i32
    %2 = arith.cmpi ne, %1, %c0_i32_0 : i32
    scf.if %2 {
      %cst_29 = arith.constant 0.000000e+00 : f32
      %35 = vector.broadcast %cst_29 : f32 to vector<1x3x8x128xf32>
      %c0_30 = arith.constant 0 : index
      %c0_31 = arith.constant 0 : index
      %c0_32 = arith.constant 0 : index
      %c0_33 = arith.constant 0 : index
      %36 = vector.load %arg4[%c0_30, %c0_31, %c0_32, %c0_33] : memref<1x3x8x128xf32, #tpu.memory_space<vmem>>, vector<1x3x8x128xf32>
      tpu.vector_store %arg4[%c0_30, %c0_31, %c0_32, %c0_33], %35 {strides = array<i32>} : memref<1x3x8x128xf32, #tpu.memory_space<vmem>>, vector<1x3x8x128xf32>,
    } else {
    }
    %c0 = arith.constant 0 : index
    %c0_1 = arith.constant 0 : index
    %3 = vector.load %arg2[%c0, %c0_1] : memref<16x128xf32, #tpu.memory_space<vmem>>, vector<16x128xf32>
    %c0_2 = arith.constant 0 : index
    %c0_3 = arith.constant 0 : index
    %4 = vector.load %arg3[%c0_2, %c0_3] : memref<16x128xf32, #tpu.memory_space<vmem>>, vector<16x128xf32>
    %5 = arith.negf %3 : vector<16x128xf32>
    %6 = math.exp %5 : vector<16x128xf32>
    %cst = arith.constant 1.000000e+00 : f32
    %7 = vector.broadcast %cst : f32 to vector<16x128xf32>
    %8 = arith.addf %7, %6 : vector<16x128xf32>
    %9 = arith.divf %7, %8 : vector<16x128xf32>
    %c0_4 = arith.constant 0 : index
    %c0_5 = arith.constant 0 : index
    %c0_6 = arith.constant 0 : index
    %c0_7 = arith.constant 0 : index
    %10 = vector.load %arg4[%c0_4, %c0_5, %c0_6, %c0_7] : memref<1x3x8x128xf32, #tpu.memory_space<vmem>>, vector<1x1x8x128xf32>
    %11 = vector.shape_cast %10 : vector<1x1x8x128xf32> to vector<8x128xf32>
    %12 = arith.mulf %9, %4 : vector<16x128xf32>
    %13 = vector.shape_cast %12 : vector<16x128xf32> to vector<2x8x128xf32>
    %cst_8 = arith.constant dense<0.000000e+00> : vector<8x128xf32>
    %14 = vector.multi_reduction <add>, %13, %cst_8 [0] : vector<2x8x128xf32> to vector<8x128xf32>
    %15 = arith.addf %11, %14 : vector<8x128xf32>
    %c0_9 = arith.constant 0 : index
    %c0_10 = arith.constant 0 : index
    %c0_11 = arith.constant 0 : index
    %c0_12 = arith.constant 0 : index
    %16 = vector.load %arg4[%c0_9, %c0_10, %c0_11, %c0_12] : memref<1x3x8x128xf32, #tpu.memory_space<vmem>>, vector<1x1x8x128xf32>
    %17 = vector.shape_cast %16 : vector<1x1x8x128xf32> to vector<8x128xf32>
    %18 = vector.shape_cast %15 : vector<8x128xf32> to vector<1x1x8x128xf32>
    tpu.vector_store %arg4[%c0_9, %c0_10, %c0_11, %c0_12], %18 {strides = array<i32>} : memref<1x3x8x128xf32, #tpu.memory_space<vmem>>, vector<1x1x8x128xf32>,
    %c0_13 = arith.constant 0 : index
    %c1 = arith.constant 1 : index
    %c0_14 = arith.constant 0 : index
    %c0_15 = arith.constant 0 : index
    %19 = vector.load %arg4[%c0_13, %c1, %c0_14, %c0_15] : memref<1x3x8x128xf32, #tpu.memory_space<vmem>>, vector<1x1x8x128xf32>
    %20 = vector.shape_cast %19 : vector<1x1x8x128xf32> to vector<8x128xf32>
    %21 = vector.shape_cast %9 : vector<16x128xf32> to vector<2x8x128xf32>
    %cst_16 = arith.constant dense<0.000000e+00> : vector<8x128xf32>
    %22 = vector.multi_reduction <add>, %21, %cst_16 [0] : vector<2x8x128xf32> to vector<8x128xf32>
    %23 = arith.addf %20, %22 : vector<8x128xf32>
    %c0_17 = arith.constant 0 : index
    %c1_18 = arith.constant 1 : index
    %c0_19 = arith.constant 0 : index
    %c0_20 = arith.constant 0 : index
    %24 = vector.load %arg4[%c0_17, %c1_18, %c0_19, %c0_20] : memref<1x3x8x128xf32, #tpu.memory_space<vmem>>, vector<1x1x8x128xf32>
    %25 = vector.shape_cast %24 : vector<1x1x8x128xf32> to vector<8x128xf32>
    %26 = vector.shape_cast %23 : vector<8x128xf32> to vector<1x1x8x128xf32>
    tpu.vector_store %arg4[%c0_17, %c1_18, %c0_19, %c0_20], %26 {strides = array<i32>} : memref<1x3x8x128xf32, #tpu.memory_space<vmem>>, vector<1x1x8x128xf32>,
    %c0_21 = arith.constant 0 : index
    %c2 = arith.constant 2 : index
    %c0_22 = arith.constant 0 : index
    %c0_23 = arith.constant 0 : index
    %27 = vector.load %arg4[%c0_21, %c2, %c0_22, %c0_23] : memref<1x3x8x128xf32, #tpu.memory_space<vmem>>, vector<1x1x8x128xf32>
    %28 = vector.shape_cast %27 : vector<1x1x8x128xf32> to vector<8x128xf32>
    %29 = vector.shape_cast %4 : vector<16x128xf32> to vector<2x8x128xf32>
    %cst_24 = arith.constant dense<0.000000e+00> : vector<8x128xf32>
    %30 = vector.multi_reduction <add>, %29, %cst_24 [0] : vector<2x8x128xf32> to vector<8x128xf32>
    %31 = arith.addf %28, %30 : vector<8x128xf32>
    %c0_25 = arith.constant 0 : index
    %c2_26 = arith.constant 2 : index
    %c0_27 = arith.constant 0 : index
    %c0_28 = arith.constant 0 : index
    %32 = vector.load %arg4[%c0_25, %c2_26, %c0_27, %c0_28] : memref<1x3x8x128xf32, #tpu.memory_space<vmem>>, vector<1x1x8x128xf32>
    %33 = vector.shape_cast %32 : vector<1x1x8x128xf32> to vector<8x128xf32>
    %34 = vector.shape_cast %31 : vector<8x128xf32> to vector<1x1x8x128xf32>
    tpu.vector_store %arg4[%c0_25, %c2_26, %c0_27, %c0_28], %34 {strides = array<i32>} : memref<1x3x8x128xf32, #tpu.memory_space<vmem>>, vector<1x1x8x128xf32>,
    return
  }
  func.func @transform_0(%arg0: i32, %arg1: i32) -> (i32, i32) {
    %c1_i32 = arith.constant 1 : i32
    %0 = arith.muli %arg0, %c1_i32 : i32
    %1 = arith.addi %0, %arg1 : i32
    %c0_i32 = arith.constant 0 : i32
    %2 = arith.minsi %1, %c0_i32 : i32
    %c0_i32_0 = arith.constant 0 : i32
    %c0_i32_1 = arith.constant 0 : i32
    return %2, %c0_i32_0 : i32, i32
  }
  func.func @transform_1(%arg0: i32, %arg1: i32) -> (i32, i32) {
    %c1_i32 = arith.constant 1 : i32
    %0 = arith.muli %arg0, %c1_i32 : i32
    %1 = arith.addi %0, %arg1 : i32
    %c0_i32 = arith.constant 0 : i32
    %2 = arith.minsi %1, %c0_i32 : i32
    %c0_i32_0 = arith.constant 0 : i32
    %c0_i32_1 = arith.constant 0 : i32
    return %2, %c0_i32_0 : i32, i32
  }
  func.func @transform_2(%arg0: i32, %arg1: i32) -> (i32, i32, i32, i32) {
    %c0_i32 = arith.constant 0 : i32
    %c0_i32_0 = arith.constant 0 : i32
    %c0_i32_1 = arith.constant 0 : i32
    %c0_i32_2 = arith.constant 0 : i32
    return %arg0, %c0_i32, %c0_i32_0, %c0_i32_1 : i32, i32, i32, i32
  }
}

</mosaic_0001>

<bundles_post_ra>
// kernel: tpu_custom_call.1
= control target key start
LH: loop header
LB: loop body
LE: loop exit
PB: predicated region body
PF: predicated region fallthrough
CT: control target
= control target key end

     0   :  { %7 = vsyncpa [#allocation3], 0  ;;  %s285_s0 = inlined_call_operand.hbm [shape: f32[16,128], index: 0, kind: input, shape index: {}]   ;;  %s286_s1 = inlined_call_operand.hbm [shape: f32[16,128], index: 1, kind: input, shape index: {}]   ;;  %s287_s2 = inlined_call_operand.hbm [shape: f32[1,3,8,128], index: 2, kind: output, shape index: {}]  }
   0x1   :  { %8 = vsyncpa [#allocation6], 0 }
   0x2   :  { %9 = vsyncpa [#allocation4], 0  ;;  %s20_s11 = sshll.u32 %s285_s0, 4  ;;  %s247_s12 = smov [#allocation2]   ;;  %s21_s11 = int_to_ptr.hbm [resolvable:$true] %s20_s11 }
   0x3   :  { %s22_s13 = sshll.u32 %s247_s12, 4  ;;  %s39_s16 = sshll.u32 %s286_s1, 4  ;;  %s23_s13 = int_to_ptr.vmem [resolvable:$true] %s22_s13  ;;  %s40_s16 = int_to_ptr.hbm [resolvable:$true] %s39_s16 }
   0x4   :  { %s248_s17 = smov 128   ;;  %s249_s18 = smov 8  }
   0x5   :  { %28 = dma.hbm_to_vmem [thread:$0]  %s21_s11, 256, %s23_s13, [#allocation3], %s248_s17, %s248_s17, %s249_s18  }
   0x6   :  { %s250_s19 = smov [#allocation5]  }
   0x7   :  { %s41_s20 = sshll.u32 %s250_s19, 4  ;;  %s42_s20 = int_to_ptr.vmem [resolvable:$true] %s41_s20 }
   0x8   :  { %47 = dma.hbm_to_vmem [thread:$0]  %s40_s16, 256, %s42_s20, [#allocation6], %s248_s17, %s248_s17, %s249_s18  }
   0x9   :  { %241 = dma.done.wait [#allocation3], 256  }
   0xa   :  { %242 = vsyncadd [#allocation3], 4294967040 }
   0xb   :  { %243 = dma.done.wait [#allocation6], 256  }
   0xc   :  { %244 = vsyncadd [#allocation6], 4294967040  ;;  %v71_v0 = vld [vmem:[#allocation2] sm:$0xff]  ;;  %v72_v1 = vld [vmem:[#allocation2 + $0x8] sm:$0xff]  ;;  %s251_s0 = smov [#allocation7]   ;;  %s135_s23 = sshll.u32 %s287_s2, 4  ;;  %s136_s23 = int_to_ptr.hbm [resolvable:$true] %s135_s23 }
   0xd   :  { %v73_v2 = vld [vmem:[#allocation5] sm:$0xff]  ;;  %v74_v3 = vld [vmem:[#allocation5 + $0x8] sm:$0xff]  ;;  %v153_v4 = vmul.f32 -1.442695, %v71_v0  ;;  %v154_v5 = vmul.f32 -1.442695, %v72_v1 }
   0xe   :  { %v126_v6 = vadd.f32 %v74_v3, %v73_v2  ;;  %s133_s1 = sshll.u32 %s251_s0, 4  ;;  %s134_s1 = int_to_ptr.vmem [resolvable:$true] %s133_s1 }
   0xf   :  { %161 = vpow2.f32 %v153_v4 }
  0x10   :  { %163 = vpow2.f32 %v154_v5  ;;  %128 = vst [vmem:[#allocation7 + $0x10] sm:$0xff] %v126_v6 }
  0x15   :  { %v162_v7 = vpop.eup %161 }
  0x16   :  { %v164_v8 = vpop.eup %163  ;;  %v81_v9 = vadd.f32 1.0, %v162_v7 }
  0x17   :  { %v82_v10 = vadd.f32 1.0, %v164_v8 }
  0x18   :  { %165 = vrcp.f32 %v81_v9  ;;  %vm88_vm0 = vweird.f32 %v81_v9  ;;  %v94_v14 = vand.u32 2147483648, %v81_v9  ;;  %v92_v17 = vand.u32 2147483647, %v81_v9 }
  0x19   :  { %167 = vrcp.f32 %v82_v10  ;;  %v109_v18 = vand.u32 2147483648, %v82_v10  ;;  %vm103_vm2 = vweird.f32 %v82_v10  ;;  %v107_v20 = vand.u32 2147483647, %v82_v10 }
  0x1a   :  { %v95_v22 = vor.u32 1.1754944e-38, %v94_v14  ;;  %vm93_vm5 = vcmp.eq.f32.partialorder %v92_v17, 8.507059e+37 }
  0x1b   :  { %v110_v25 = vor.u32 1.1754944e-38, %v109_v18  ;;  %vm108_vm7 = vcmp.eq.f32.partialorder %v107_v20, 8.507059e+37 }
  0x1e   :  { %v166_v11 = vpop.eup %165 }
  0x1f   :  { %v168_v12 = vpop.eup %167  ;;  %v84_v13 = vmul.f32 %v166_v11, %v81_v9  ;;  %vm89_vm1 = vweird.f32 %v166_v11 }
  0x20   :  { %v99_v15 = vmul.f32 %v168_v12, %v82_v10  ;;  %vm104_vm3 = vweird.f32 %v168_v12  ;;  %vm90_vm4 = vmor %vm88_vm0, %vm89_vm1 }
  0x21   :  { %v85_v16 = vsub.f32 1.0, %v84_v13  ;;  %vm105_vm6 = vmor %vm103_vm2, %vm104_vm3 }
  0x22   :  { %v100_v19 = vsub.f32 1.0, %v99_v15 }
  0x23   :  { %v86_v21 = vmul.f32 %v166_v11, %v85_v16 }
  0x24   :  { %v101_v23 = vmul.f32 %v168_v12, %v100_v19 }
  0x25   :  { %v87_v24 = vadd.f32 %v166_v11, %v86_v21 }
  0x26   :  { %v102_v26 = vadd.f32 %v168_v12, %v101_v23 }
  0x27   :  { %v91_v27 = vsel %vm90_vm4, %v166_v11, %v87_v24 }
  0x28   :  { %v96_v28 = vsel %vm93_vm5, %v95_v22, %v91_v27  ;;  %v106_v29 = vsel %vm105_vm6, %v168_v12, %v102_v26 }
  0x29   :  { %v111_v30 = vsel %vm108_vm7, %v110_v25, %v106_v29  ;;  %v114_v31 = vmul.f32 %v96_v28, %v73_v2 }
  0x2a   :  { %v115_v32 = vmul.f32 %v111_v30, %v74_v3  ;;  %v121_v33 = vadd.f32 %v111_v30, %v96_v28 }
  0x2c   :  { %v116_v34 = vadd.f32 %v115_v32, %v114_v31  ;;  %123 = vst [vmem:[#allocation7 + $0x8] sm:$0xff] %v121_v33 }
  0x2e   :  { %118 = vst [vmem:[#allocation7] sm:$0xff] %v116_v34 }
  0x2f   :  { %141 = dma.vmem_to_hbm [thread:$0]  %s134_s1, 384, %s136_s23, [#allocation4], %s248_s17, %s248_s17, %s249_s18  }
  0x30   :  { %245 = dma.done.wait [#allocation4], 384  }
  0x31   :  { %246 = vsyncadd [#allocation4], 4294966912 }
  0x32   :  { %146 = vsyncpa [#allocation3], 1 }
  0x33   :  { %147 = vsyncpa [#allocation6], 1 }
  0x34   :  { %148 = vsyncpa [#allocation4], 1 }

</bundles_post_ra>
